<compile_context>
chip_gen: v7x
topology: tpu7x:2x2x1
jax: 0.10.0
libtpu: 0.0.40
codegen_flags: <defaults>
</compile_context>

<pallas_src>
import functools

import jax
import jax.numpy as jnp
from jax.experimental import pallas as pl
from jax.experimental.pallas import tpu as pltpu

LANE = 128
SUBLANE = 8


def _round_up(x, m):
    return (x + m - 1) // m * m


# ----------------------------- Pallas kernel --------------------------------

def _fused_mlp_kernel(*refs, num_layers):
    """refs = (x, w_0..w_{L-1}, s_0..s_{L-1}, out)

    x   : (tm, Kin)      f32 input rows
    w_l : (K_l, N_l)     bf16 folded (Linear + eval-BN) weights, x @ W layout
    s_l : (1, N_l)       f32 folded per-channel shifts
    out : (tm, Nout_pad) f32 lane-dense output rows
    """
    x_ref = refs[0]
    w_refs = refs[1:1 + num_layers]
    s_refs = refs[1 + num_layers:1 + 2 * num_layers]
    o_ref = refs[1 + 2 * num_layers]

    h = x_ref[...].astype(jnp.bfloat16)
    for li in range(num_layers - 1):
        y = jnp.dot(h, w_refs[li][...], preferred_element_type=jnp.float32)
        h = jnp.maximum(y + s_refs[li][...], 0.0).astype(jnp.bfloat16)
        # dropout: identity in eval mode
    y = jnp.dot(h, w_refs[num_layers - 1][...],
                preferred_element_type=jnp.float32)
    o_ref[...] = (y + s_refs[num_layers - 1][...]).astype(o_ref.dtype)


def fused_mlp_call(x_pad, weights, shifts, *, tm):
    Mp, Kin = x_pad.shape
    L = len(weights)
    Nout = weights[-1].shape[1]

    # Resident (constant index_map) parameters: single-buffered.
    w_specs = [
        pl.BlockSpec(w.shape, lambda i: (0, 0), pipeline_mode=pl.Buffered(1))
        for w in weights
    ]
    s_specs = [
        pl.BlockSpec(s.shape, lambda i: (0, 0), pipeline_mode=pl.Buffered(1))
        for s in shifts
    ]

    # VMEM budget: weights/shifts (1 buffer each) + double-buffered x/out
    # tiles + a few live copies of the widest intermediate activation.
    w_bytes = sum(int(w.size) * w.dtype.itemsize for w in weights)
    s_bytes = sum(int(s.size) * s.dtype.itemsize for s in shifts)
    max_n = max(w.shape[1] for w in weights)
    vmem_est = (w_bytes + s_bytes
                + 2 * tm * Kin * 4 + 2 * tm * Nout * 4 + 3 * tm * max_n * 4)
    vmem_limit = int(min(100 << 20, max(8 << 20, 2 * vmem_est)))

    flops = 2 * Mp * sum(w.shape[0] * w.shape[1] for w in weights)
    bytes_accessed = (int(x_pad.size) * 4 + Mp * Nout * 4 + w_bytes + s_bytes)

    kernel = functools.partial(_fused_mlp_kernel, num_layers=L)
    return pl.pallas_call(
        kernel,
        out_shape=jax.ShapeDtypeStruct((Mp, Nout), jnp.float32),
        grid_spec=pltpu.PrefetchScalarGridSpec(
            num_scalar_prefetch=0,
            grid=(Mp // tm,),
            in_specs=[pl.BlockSpec((tm, Kin), lambda i: (i, 0))]
                     + w_specs + s_specs,
            out_specs=pl.BlockSpec((tm, Nout), lambda i: (i, 0)),
        ),
        compiler_params=pltpu.CompilerParams(
            dimension_semantics=("parallel",),
            vmem_limit_bytes=vmem_limit),
        cost_estimate=pl.CostEstimate(flops=flops, transcendentals=0,
                                      bytes_accessed=bytes_accessed),
    )(x_pad, *weights, *shifts)


# ------------------------------ wrapper --------------------------------------

def _num_tensorcores():
    try:
        kind = jax.devices()[0].device_kind.lower()
    except Exception:
        return 1
    # v7x-class chips expose 2 TensorCores sharded via the "parallel" grid axis.
    return 2 if ("v7" in kind or "v4" in kind or "v5p" in kind) else 1


def pick_tm(m, num_cores, max_tm=512):
    tm = _round_up(max(1, -(-m // num_cores)), SUBLANE)
    return int(min(tm, max_tm))


@functools.partial(jax.jit, static_argnames=("tm", "out_channels"))
def _mlp_forward(x, weights, shifts, *, tm, out_channels):
    M, C = x.shape
    Kin = weights[0].shape[0]
    Mp = _round_up(M, tm)
    if Mp != M or Kin != C:
        x_in = jnp.zeros((Mp, Kin), x.dtype).at[:M, :C].set(x)
    else:
        x_in = x  # no wrapper-side padding pass when shapes already align
    out_pad = fused_mlp_call(x_in, weights, shifts, tm=tm)
    return out_pad[:M, :out_channels]


def mlp_forward(x, weights, shifts, *, out_channels):
    tm = pick_tm(x.shape[0], _num_tensorcores())
    return _mlp_forward(x, weights, shifts, tm=tm, out_channels=out_channels)


# --------------------------- parameters & folding ---------------------------

def init_mlp_params(key, in_channels, hidden_channels, out_channels, num_layers):
    """Deterministic synthetic params mirroring the PyTorch module shapes."""
    dims = [in_channels] + [hidden_channels] * (num_layers - 1) + [out_channels]
    params = {"linears": [], "bns": []}
    for li in range(num_layers):
        key, kw, kb = jax.random.split(key, 3)
        fan_in, fan_out = dims[li], dims[li + 1]
        bound = 1.0 / jnp.sqrt(fan_in)
        # stored transposed: (in, out); kernel computes x @ W
        w = jax.random.uniform(kw, (fan_in, fan_out), jnp.float32, -bound, bound)
        b = jax.random.uniform(kb, (1, fan_out), jnp.float32, -bound, bound)
        params["linears"].append((w, b))
    for _ in range(num_layers - 1):
        key, kg, kbt, km, kv = jax.random.split(key, 5)
        gamma = 1.0 + 0.1 * jax.random.normal(kg, (1, hidden_channels), jnp.float32)
        beta = 0.1 * jax.random.normal(kbt, (1, hidden_channels), jnp.float32)
        mean = 0.1 * jax.random.normal(km, (1, hidden_channels), jnp.float32)
        var = jnp.abs(1.0 + 0.1 * jax.random.normal(kv, (1, hidden_channels),
                                                    jnp.float32))
        params["bns"].append((gamma, beta, mean, var))
    return params


def fold_and_pad_params(params, num_layers, eps=1e-5):
    """Fold bias + eval-mode BN into each Linear:
         w' = w * scale,  s' = b * scale + (beta - mean * scale),
         scale = gamma / sqrt(running_var + eps)
    Pad K dims only to 8 sublanes, hidden (on-chip) dims to 8, and only the
    final HBM-bound output dim to 128 lanes. Weights are cast to bf16."""
    weights, shifts = [], []
    for li in range(num_layers):
        w, b = params["linears"][li]
        if li < num_layers - 1:
            gamma, beta, mean, var = params["bns"][li]
            scale = gamma / jnp.sqrt(var + eps)
            w_f = w * scale
            s_f = b * scale + (beta - mean * scale)
        else:
            w_f, s_f = w, b
        K, N = w_f.shape
        Kp = _round_up(K, SUBLANE)
        Np = _round_up(N, LANE) if li == num_layers - 1 else _round_up(N, SUBLANE)
        w_p = jnp.zeros((Kp, Np), jnp.bfloat16).at[:K, :N].set(
            w_f.astype(jnp.bfloat16))
        s_p = jnp.zeros((1, Np), jnp.float32).at[:, :N].set(s_f)
        weights.append(w_p)
        shifts.append(s_p)
    return weights, shifts


# ------------------------------ reference -----------------------------------

def mlp_reference(x, params, num_layers, eps=1e-5):
    h = x
    for li in range(num_layers - 1):
        w, b = params["linears"][li]
        gamma, beta, mean, var = params["bns"][li]
        h = h @ w + b
        h = (h - mean) / jnp.sqrt(var + eps) * gamma + beta
        h = jnp.maximum(h, 0.0)
    w, b = params["linears"][-1]
    return h @ w + b


# --------------------------------- main --------------------------------------

if __name__ == "__main__":
    key = jax.random.PRNGKey(0)

    num_nodes = 256
    in_channels = 32
    hidden_channels = 64
    out_channels = 16
    num_layers = 3
    dropout = 0.5  # identity in eval mode

    key, kx, kp = jax.random.split(key, 3)
    x = jax.random.normal(kx, (num_nodes, in_channels), jnp.float32)
    params = init_mlp_params(kp, in_channels, hidden_channels, out_channels,
                             num_layers)
    weights, shifts = fold_and_pad_params(params, num_layers)

    out = mlp_forward(x, weights, shifts, out_channels=out_channels)
    out = jax.block_until_ready(out)

    ref = mlp_reference(x, params, num_layers)
    assert out.shape == (num_nodes, out_channels)
    max_err = float(jnp.max(jnp.abs(out - ref)))
    # bf16 matmul operands (f32 accumulation) -> loosened tolerance vs f32 ref.
    assert jnp.allclose(out, ref, atol=3e-2, rtol=3e-2), \
        f"mismatch vs reference (max abs err {max_err:.4e})"

    print("KERNEL_OK")
</pallas_src>

<mosaic_0001>
module attributes {stable_mosaic.version = 11 : i64} {
  func.func @_fused_mlp_kernel(%arg0: i32, %arg1: memref<256x32xf32, #tpu.memory_space<vmem>>, %arg2: memref<32x64xbf16, #tpu.memory_space<vmem>>, %arg3: memref<64x64xbf16, #tpu.memory_space<vmem>>, %arg4: memref<64x128xbf16, #tpu.memory_space<vmem>>, %arg5: memref<1x64xf32, #tpu.memory_space<vmem>>, %arg6: memref<1x64xf32, #tpu.memory_space<vmem>>, %arg7: memref<1x128xf32, #tpu.memory_space<vmem>>, %arg8: memref<256x128xf32, #tpu.memory_space<vmem>>) attributes {dimension_semantics = [#tpu.dimension_semantics<parallel>], iteration_bounds = array<i64: 1>, scalar_prefetch = 0 : i64, scratch_operands = 0 : i64, tpu.core_type = #tpu.core_type<tc>, window_params = [{transform_indices = @transform_0, window_bounds = array<i64: 256, 32>}, {pipeline_mode = #tpu.pipeline_mode<synchronous>, transform_indices = @transform_1, window_bounds = array<i64: 32, 64>}, {pipeline_mode = #tpu.pipeline_mode<synchronous>, transform_indices = @transform_2, window_bounds = array<i64: 64, 64>}, {pipeline_mode = #tpu.pipeline_mode<synchronous>, transform_indices = @transform_3, window_bounds = array<i64: 64, 128>}, {pipeline_mode = #tpu.pipeline_mode<synchronous>, transform_indices = @transform_4, window_bounds = array<i64: 1, 64>}, {pipeline_mode = #tpu.pipeline_mode<synchronous>, transform_indices = @transform_5, window_bounds = array<i64: 1, 64>}, {pipeline_mode = #tpu.pipeline_mode<synchronous>, transform_indices = @transform_6, window_bounds = array<i64: 1, 128>}, {transform_indices = @transform_7, window_bounds = array<i64: 256, 128>}]} {
    %c0 = arith.constant 0 : index
    %c0_0 = arith.constant 0 : index
    %0 = vector.load %arg1[%c0, %c0_0] : memref<256x32xf32, #tpu.memory_space<vmem>>, vector<256x32xf32>
    %1 = arith.truncf %0 : vector<256x32xf32> to vector<256x32xbf16>
    %c0_1 = arith.constant 0 : index
    %c0_2 = arith.constant 0 : index
    %2 = vector.load %arg2[%c0_1, %c0_2] : memref<32x64xbf16, #tpu.memory_space<vmem>>, vector<32x64xbf16>
    %cst = arith.constant dense<0.000000e+00> : vector<256x64xf32>
    %3 = tpu.matmul %1, %2, %cst {dimension_numbers = #tpu.dot_dimension_numbers<[1], [0], [0], [1], [0, 0, 1, 1], [], []>} : vector<256x32xbf16>, vector<32x64xbf16>, vector<256x64xf32> -> vector<256x64xf32>
    %c0_3 = arith.constant 0 : index
    %c0_4 = arith.constant 0 : index
    %4 = vector.load %arg5[%c0_3, %c0_4] : memref<1x64xf32, #tpu.memory_space<vmem>>, vector<1x64xf32>
    %5 = vector.broadcast %4 : vector<1x64xf32> to vector<256x64xf32>
    %6 = arith.addf %3, %5 : vector<256x64xf32>
    %cst_5 = arith.constant 0.000000e+00 : f32
    %7 = vector.broadcast %cst_5 : f32 to vector<256x64xf32>
    %8 = arith.maximumf %6, %7 : vector<256x64xf32>
    %9 = arith.truncf %8 : vector<256x64xf32> to vector<256x64xbf16>
    %c0_6 = arith.constant 0 : index
    %c0_7 = arith.constant 0 : index
    %10 = vector.load %arg3[%c0_6, %c0_7] : memref<64x64xbf16, #tpu.memory_space<vmem>>, vector<64x64xbf16>
    %cst_8 = arith.constant dense<0.000000e+00> : vector<256x64xf32>
    %11 = tpu.matmul %9, %10, %cst_8 {dimension_numbers = #tpu.dot_dimension_numbers<[1], [0], [0], [1], [0, 0, 1, 1], [], []>} : vector<256x64xbf16>, vector<64x64xbf16>, vector<256x64xf32> -> vector<256x64xf32>
    %c0_9 = arith.constant 0 : index
    %c0_10 = arith.constant 0 : index
    %12 = vector.load %arg6[%c0_9, %c0_10] : memref<1x64xf32, #tpu.memory_space<vmem>>, vector<1x64xf32>
    %13 = vector.broadcast %12 : vector<1x64xf32> to vector<256x64xf32>
    %14 = arith.addf %11, %13 : vector<256x64xf32>
    %cst_11 = arith.constant 0.000000e+00 : f32
    %15 = vector.broadcast %cst_11 : f32 to vector<256x64xf32>
    %16 = arith.maximumf %14, %15 : vector<256x64xf32>
    %17 = arith.truncf %16 : vector<256x64xf32> to vector<256x64xbf16>
    %c0_12 = arith.constant 0 : index
    %c0_13 = arith.constant 0 : index
    %18 = vector.load %arg4[%c0_12, %c0_13] : memref<64x128xbf16, #tpu.memory_space<vmem>>, vector<64x128xbf16>
    %cst_14 = arith.constant dense<0.000000e+00> : vector<256x128xf32>
    %19 = tpu.matmul %17, %18, %cst_14 {dimension_numbers = #tpu.dot_dimension_numbers<[1], [0], [0], [1], [0, 0, 1, 1], [], []>} : vector<256x64xbf16>, vector<64x128xbf16>, vector<256x128xf32> -> vector<256x128xf32>
    %c0_15 = arith.constant 0 : index
    %c0_16 = arith.constant 0 : index
    %20 = vector.load %arg7[%c0_15, %c0_16] : memref<1x128xf32, #tpu.memory_space<vmem>>, vector<1x128xf32>
    %21 = vector.broadcast %20 : vector<1x128xf32> to vector<256x128xf32>
    %22 = arith.addf %19, %21 : vector<256x128xf32>
    %c0_17 = arith.constant 0 : index
    %c0_18 = arith.constant 0 : index
    %23 = vector.load %arg8[%c0_17, %c0_18] : memref<256x128xf32, #tpu.memory_space<vmem>>, vector<256x128xf32>
    tpu.vector_store %arg8[%c0_17, %c0_18], %22 {strides = array<i32>} : memref<256x128xf32, #tpu.memory_space<vmem>>, vector<256x128xf32>,
    return
  }
  func.func @transform_0(%arg0: i32) -> (i32, i32) {
    %c0_i32 = arith.constant 0 : i32
    %c0_i32_0 = arith.constant 0 : i32
    return %arg0, %c0_i32 : i32, i32
  }
  func.func @transform_1(%arg0: i32) -> (i32, i32) {
    %c0_i32 = arith.constant 0 : i32
    %c0_i32_0 = arith.constant 0 : i32
    %c0_i32_1 = arith.constant 0 : i32
    return %c0_i32, %c0_i32_0 : i32, i32
  }
  func.func @transform_2(%arg0: i32) -> (i32, i32) {
    %c0_i32 = arith.constant 0 : i32
    %c0_i32_0 = arith.constant 0 : i32
    %c0_i32_1 = arith.constant 0 : i32
    return %c0_i32, %c0_i32_0 : i32, i32
  }
  func.func @transform_3(%arg0: i32) -> (i32, i32) {
    %c0_i32 = arith.constant 0 : i32
    %c0_i32_0 = arith.constant 0 : i32
    %c0_i32_1 = arith.constant 0 : i32
    return %c0_i32, %c0_i32_0 : i32, i32
  }
  func.func @transform_4(%arg0: i32) -> (i32, i32) {
    %c0_i32 = arith.constant 0 : i32
    %c0_i32_0 = arith.constant 0 : i32
    %c0_i32_1 = arith.constant 0 : i32
    return %c0_i32, %c0_i32_0 : i32, i32
  }
  func.func @transform_5(%arg0: i32) -> (i32, i32) {
    %c0_i32 = arith.constant 0 : i32
    %c0_i32_0 = arith.constant 0 : i32
    %c0_i32_1 = arith.constant 0 : i32
    return %c0_i32, %c0_i32_0 : i32, i32
  }
  func.func @transform_6(%arg0: i32) -> (i32, i32) {
    %c0_i32 = arith.constant 0 : i32
    %c0_i32_0 = arith.constant 0 : i32
    %c0_i32_1 = arith.constant 0 : i32
    return %c0_i32, %c0_i32_0 : i32, i32
  }
  func.func @transform_7(%arg0: i32) -> (i32, i32) {
    %c0_i32 = arith.constant 0 : i32
    %c0_i32_0 = arith.constant 0 : i32
    return %arg0, %c0_i32 : i32, i32
  }
}

</mosaic_0001>

<bundles_post_ra>
// kernel: _mlp_forward.1
= control target key start
LH: loop header
LB: loop body
LE: loop exit
PB: predicated region body
PF: predicated region fallthrough
CT: control target
= control target key end

     0   :  { %vm98_vm0 = vcmask 261120   ;;  %vm395_vm1 = vcmask 523264   ;;  %s1616_s1 = inlined_call_operand.vmem [shape: bf16[32,64], index: 1, kind: input, shape index: {}]   ;;  %s1617_s0 = inlined_call_operand.vmem [shape: f32[256,32], index: 0, kind: input, shape index: {}]   ;;  %s1618_s2 = inlined_call_operand.vmem [shape: bf16[64,64], index: 2, kind: input, shape index: {}]   ;;  %s1619_s3 = inlined_call_operand.vmem [shape: bf16[64,128], index: 3, kind: input, shape index: {}]   ;;  %s1620_s4 = inlined_call_operand.vmem [shape: f32[1,64], index: 4, kind: input, shape index: {}]   ;;  %s1621_s5 = inlined_call_operand.vmem [shape: f32[1,64], index: 5, kind: input, shape index: {}]   ;;  %s1622_s6 = inlined_call_operand.vmem [shape: f32[1,128], index: 6, kind: input, shape index: {}]   ;;  %s1623_s7 = inlined_call_operand.vmem [shape: f32[256,128], index: 7, kind: output, shape index: {}]  }
   0x1   :  { %v1176_v0 = vld [vmem:[%s1616_s1] sm:$0xff]   ;;  %v1177_v1 = vld [vmem:[%s1616_s1 + $0x8] sm:$0xff]   ;;  %v29_v5 = vld [vmem:[%s1617_s0 + $0x10] sm:$0xff] }
   0x2   :  { %1056 = vmatprep.subr.bf16.mxu0 %v1176_v0  ;;  %v27_v2 = vld [vmem:[%s1617_s0] sm:$0xff]  ;;  %v28_v3 = vld [vmem:[%s1617_s0 + $0x8] sm:$0xff]  ;;  %1172 = vmatprep.subr.bf16.mxu1 %v1176_v0  ;;  %v30_v6 = vld [vmem:[%s1617_s0 + $0x18] sm:$0xff] }
   0x3   :  { %1057 = vmatpush3.bf16.msra.mxu0 %v1176_v0  ;;  %v59_v4 = vpack.c.bf16 %v28_v3, %v27_v2  ;;  %1174 = vmatpush3.bf16.msra.mxu1 %v1176_v0  ;;  %v31_v7 = vld [vmem:[%s1617_s0 + $0x20] sm:$0xff]  ;;  %v32_v8 = vld [vmem:[%s1617_s0 + $0x28] sm:$0xff]  ;;  %v60_v9 = vpack.c.bf16 %v30_v6, %v29_v5  ;;  %v45_v14 = vld [vmem:[%s1617_s0 + $0x90] sm:$0xff] }
   0x4   :  { %1058 = vmatprep.subr.bf16.mxu0 %v1177_v1  ;;  %1173 = vmatprep.subr.bf16.mxu1 %v1177_v1  ;;  %v61_v10 = vpack.c.bf16 %v32_v8, %v31_v7  ;;  %v43_v11 = vld [vmem:[%s1617_s0 + $0x80] sm:$0xff]  ;;  %v44_v12 = vld [vmem:[%s1617_s0 + $0x88] sm:$0xff]  ;;  %v46_v15 = vld [vmem:[%s1617_s0 + $0x98] sm:$0xff] }
   0x5   :  { %1060 = vmatprep.mubr.msk.bf16.mxu0 %vm98_vm0, %v59_v4  ;;  %v67_v13 = vpack.c.bf16 %v44_v12, %v43_v11  ;;  %v47_v16 = vld [vmem:[%s1617_s0 + $0xa0] sm:$0xff]  ;;  %v68_v17 = vpack.c.bf16 %v46_v15, %v45_v14  ;;  %v48_v18 = vld [vmem:[%s1617_s0 + $0xa8] sm:$0xff]  ;;  %v33_v19 = vld [vmem:[%s1617_s0 + $0x30] sm:$0xff] }
   0x6   :  { %v34_v20 = vld [vmem:[%s1617_s0 + $0x38] sm:$0xff]  ;;  %v35_v21 = vld [vmem:[%s1617_s0 + $0x40] sm:$0xff]  ;;  %v69_v22 = vpack.c.bf16 %v48_v18, %v47_v16  ;;  %v36_v23 = vld [vmem:[%s1617_s0 + $0x48] sm:$0xff] }
   0x7   :  { %1059 = vmatpush3.bf16.msra.mxu0 %v1177_v1  ;;  %1175 = vmatpush3.bf16.msra.mxu1 %v1177_v1  ;;  %v49_v24 = vld [vmem:[%s1617_s0 + $0xb0] sm:$0xff]  ;;  %v50_v25 = vld [vmem:[%s1617_s0 + $0xb8] sm:$0xff]  ;;  %v51_v26 = vld [vmem:[%s1617_s0 + $0xc0] sm:$0xff]  ;;  %v62_v29 = vpack.c.bf16 %v34_v20, %v33_v19  ;;  %v63_v31 = vpack.c.bf16 %v36_v23, %v35_v21 }
   0x8   :  { %1076 = vmatprep.mubr.msk.bf16.mxu1 %vm98_vm0, %v67_v13  ;;  %v52_v27 = vld [vmem:[%s1617_s0 + $0xc8] sm:$0xff]  ;;  %v1178_v28 = vld [vmem:[%s1618_s2] sm:$0xff]   ;;  %v70_v32 = vpack.c.bf16 %v50_v25, %v49_v24  ;;  %v1180_v34 = vld [vmem:[%s1618_s2 + $0x10] sm:$0xff]  }
   0x9   :  { %v1179_v30 = vld [vmem:[%s1618_s2 + $0x8] sm:$0xff]   ;;  %1092 = vmatprep.subr.bf16.mxu1 %v1178_v28  ;;  %v71_v33 = vpack.c.bf16 %v52_v27, %v51_v26  ;;  %v37_v35 = vld [vmem:[%s1617_s0 + $0x50] sm:$0xff]  ;;  %v38_v36 = vld [vmem:[%s1617_s0 + $0x58] sm:$0xff] }
   0xa   :  { %1061 = vmatmul.mubr.msk.bf16.vlgmr.msra.gmra.mrb[0].mxu0 %vm98_vm0, %v60_v9  ;;  %1077 = vmatmul.mubr.msk.bf16.vlgmr.msra.gmra.mrb[0].mxu1 %vm98_vm0, %v68_v17  ;;  %v39_v37 = vld [vmem:[%s1617_s0 + $0x60] sm:$0xff]  ;;  %v40_v38 = vld [vmem:[%s1617_s0 + $0x68] sm:$0xff]  ;;  %v53_v39 = vld [vmem:[%s1617_s0 + $0xd0] sm:$0xff]  ;;  %v64_v43 = vpack.c.bf16 %v38_v36, %v37_v35 }
   0xb   :  { %1064 = vmatprep.mubr.msk.bf16.mxu0 %vm98_vm0, %v61_v10  ;;  %1080 = vmatprep.mubr.msk.bf16.mxu1 %vm98_vm0, %v69_v22  ;;  %v54_v40 = vld [vmem:[%s1617_s0 + $0xd8] sm:$0xff]  ;;  %v55_v41 = vld [vmem:[%s1617_s0 + $0xe0] sm:$0xff]  ;;  %v56_v42 = vld [vmem:[%s1617_s0 + $0xe8] sm:$0xff]  ;;  %v65_v44 = vpack.c.bf16 %v40_v38, %v39_v37 }
   0xc   :  { %1093 = vmatpush3.bf16.msra.mxu1 %v1178_v28  ;;  %v72_v45 = vpack.c.bf16 %v54_v40, %v53_v39  ;;  %v73_v46 = vpack.c.bf16 %v56_v42, %v55_v41  ;;  %v41_v47 = vld [vmem:[%s1617_s0 + $0x70] sm:$0xff]  ;;  %v42_v48 = vld [vmem:[%s1617_s0 + $0x78] sm:$0xff]  ;;  %v1182_v54 = vld [vmem:[%s1619_s3] sm:$0xff]  }
   0xd   :  { %1094 = vmatprep.subr.bf16.mxu1 %v1179_v30  ;;  %v57_v49 = vld [vmem:[%s1617_s0 + $0xf0] sm:$0xff]  ;;  %v58_v50 = vld [vmem:[%s1617_s0 + $0xf8] sm:$0xff]  ;;  %v66_v51 = vpack.c.bf16 %v42_v48, %v41_v47  ;;  %v1183_v55 = vld [vmem:[%s1619_s3 + $0x8] sm:$0xff]   ;;  %1132 = vmatprep.subr.bf16.mxu0 %v1182_v54 }
   0xe   :  { %v74_v52 = vpack.c.bf16 %v58_v50, %v57_v49  ;;  %v1181_v53 = vld [vmem:[%s1618_s2 + $0x18] sm:$0xff]   ;;  %1133 = vmatpush3.bf16.msra.mxu0 %v1182_v54  ;;  %v1184_v56 = vld [vmem:[%s1619_s3 + $0x10] sm:$0xff]   ;;  %v1368_v57 = vld [vmem:[%s1620_s4] ss:$0 sm:$0xff] }
   0xf   :  { %1134 = vmatprep.subr.bf16.mxu0 %v1183_v55 }
  0x10   :  { %1095 = vmatpush3.bf16.msra.mxu1 %v1179_v30 }
  0x11   :  { %1096 = vmatprep.subr.bf16.mxu1 %v1180_v34 }
  0x12   :  { %1065 = vmatmul.mubr.msk.bf16.gmra.mrb[4].mxu0 %vm98_vm0, %v62_v29  ;;  %1081 = vmatmul.mubr.msk.bf16.gmra.mrb[4].mxu1 %vm98_vm0, %v70_v32 }
  0x13   :  { %1068 = vmatprep.mubr.msk.bf16.mxu0 %vm98_vm0, %v63_v31  ;;  %1084 = vmatprep.mubr.msk.bf16.mxu1 %vm98_vm0, %v71_v33 }
  0x14   :  { %1097 = vmatpush3.bf16.msra.mxu1 %v1180_v34  ;;  %1135 = vmatpush3.bf16.msra.mxu0 %v1183_v55 }
  0x15   :  { %1098 = vmatprep.subr.bf16.mxu1 %v1181_v53  ;;  %1136 = vmatprep.subr.bf16.mxu0 %v1184_v56 }
  0x18   :  { %1099 = vmatpush3.bf16.msra.mxu1 %v1181_v53  ;;  %1137 = vmatpush3.bf16.msra.mxu0 %v1184_v56 }
  0x1a   :  { %1069 = vmatmul.mubr.msk.bf16.gmra.mrb[8].mxu0 %vm98_vm0, %v64_v43  ;;  %1085 = vmatmul.mubr.msk.bf16.gmra.mrb[8].mxu1 %vm98_vm0, %v72_v45 }
  0x1b   :  { %1072 = vmatprep.mubr.msk.bf16.mxu0 %vm98_vm0, %v65_v44  ;;  %1088 = vmatprep.mubr.msk.bf16.mxu1 %vm98_vm0, %v73_v46 }
  0x22   :  { %1073 = vmatmul.mubr.msk.bf16.gmra.mrb[12].mxu0 %vm98_vm0, %v66_v51  ;;  %1089 = vmatmul.mubr.msk.bf16.gmra.mrb[12].mxu1 %vm98_vm0, %v74_v52 }
  0xdd   :  { %v1062_v58 = vpop.f32.mrb[0].mxu0  ;;  %v1078_v61 = vpop.f32.mrb[0].mxu1 }
  0xde   :  { %v190_v59 = vadd.f32 %v1062_v58, %v1368_v57  ;;  %v181_v60 = vpop.f32.mrb[1].mxu0  ;;  %v254_v0 = vadd.f32 %v1078_v61, %v1368_v57  ;;  %v245_v1 = vpop.f32.mrb[1].mxu1 }
  0xdf   :  { %v182_v62 = vadd.f32 %v1368_v57, %v181_v60  ;;  %v1063_v63 = vpop.f32.mrb[2].mxu0  ;;  %v246_v4 = vadd.f32 %v1368_v57, %v245_v1  ;;  %v1079_v5 = vpop.f32.mrb[2].mxu1 }
  0xe0   :  { %v193_v2 = vadd.f32 %v1063_v63, %v1368_v57  ;;  %v184_v3 = vpop.f32.mrb[3].mxu0  ;;  %v326_v7 = vmax.f32 %v254_v0, 0.0  ;;  %v257_v8 = vadd.f32 %v1079_v5, %v1368_v57  ;;  %v248_v9 = vpop.f32.mrb[3].mxu1  ;;  %v310_v10 = vmax.f32 %v190_v59, 0.0 }
  0xe1   :  { %v185_v6 = vadd.f32 %v1368_v57, %v184_v3  ;;  %v324_v12 = vmax.f32 %v246_v4, 0.0  ;;  %v249_v13 = vadd.f32 %v1368_v57, %v248_v9  ;;  %v308_v14 = vmax.f32 %v182_v62, 0.0 }
  0xe2   :  { %v311_v11 = vmax.f32 %v193_v2, 0.0  ;;  %v327_v16 = vmax.f32 %v257_v8, 0.0 }
  0xe3   :  { %v309_v15 = vmax.f32 %v185_v6, 0.0  ;;  %v325_v18 = vmax.f32 %v249_v13, 0.0 }
  0xe4   :  { %v341_v17 = vpack.c.bf16 %v311_v11, %v310_v10  ;;  %v1378_v21 = vpack.c.bf16 %v327_v16, %v326_v7 }
  0xe5   :  { %v340_v19 = vpack.c.bf16 %v309_v15, %v308_v14  ;;  %v1066_v20 = vpop.f32.mrb[4].mxu0  ;;  %v1381_v24 = vpack.c.bf16 %v325_v18, %v324_v12  ;;  %v1082_v25 = vpop.f32.mrb[4].mxu1 }
  0xe6   :  { %v206_v22 = vadd.f32 %v1066_v20, %v1368_v57  ;;  %v197_v23 = vpop.f32.mrb[5].mxu0  ;;  %v270_v28 = vadd.f32 %v1082_v25, %v1368_v57  ;;  %v261_v29 = vpop.f32.mrb[5].mxu1 }
  0xe7   :  { %v198_v26 = vadd.f32 %v1368_v57, %v197_v23  ;;  %v1067_v27 = vpop.f32.mrb[6].mxu0  ;;  %1100 = vmatprep.mubr.msk.bf16.mxu1 %vm395_vm1, %v340_v19  ;;  %v262_v32 = vadd.f32 %v1368_v57, %v261_v29  ;;  %v1083_v33 = vpop.f32.mrb[6].mxu1 }
  0xe8   :  { %v209_v30 = vadd.f32 %v1067_v27, %v1368_v57  ;;  %v200_v31 = vpop.f32.mrb[7].mxu0  ;;  %1101 = vmatmul.mubr.msk.bf16.vlgmr.msra.gmra.mrb[16].mxu1 %vm395_vm1, %v341_v17  ;;  %v330_v35 = vmax.f32 %v270_v28, 0.0  ;;  %v273_v36 = vadd.f32 %v1083_v33, %v1368_v57  ;;  %v264_v37 = vpop.f32.mrb[7].mxu1  ;;  %v314_v38 = vmax.f32 %v206_v22, 0.0 }
  0xe9   :  { %v201_v34 = vadd.f32 %v1368_v57, %v200_v31  ;;  %v328_v40 = vmax.f32 %v262_v32, 0.0  ;;  %v265_v41 = vadd.f32 %v1368_v57, %v264_v37  ;;  %v312_v42 = vmax.f32 %v198_v26, 0.0 }
  0xea   :  { %v315_v39 = vmax.f32 %v209_v30, 0.0  ;;  %v331_v44 = vmax.f32 %v273_v36, 0.0 }
  0xeb   :  { %v313_v43 = vmax.f32 %v201_v34, 0.0  ;;  %v329_v46 = vmax.f32 %v265_v41, 0.0 }
  0xec   :  { %v343_v45 = vpack.c.bf16 %v315_v39, %v314_v38  ;;  %v1392_v49 = vpack.c.bf16 %v331_v44, %v330_v35 }
  0xed   :  { %v342_v47 = vpack.c.bf16 %v313_v43, %v312_v42  ;;  %v1070_v48 = vpop.f32.mrb[8].mxu0  ;;  %v350_v52 = vpack.c.bf16 %v329_v46, %v328_v40  ;;  %v1086_v53 = vpop.f32.mrb[8].mxu1 }
  0xee   :  { %v222_v50 = vadd.f32 %v1070_v48, %v1368_v57  ;;  %v213_v51 = vpop.f32.mrb[9].mxu0  ;;  %v286_v56 = vadd.f32 %v1086_v53, %v1368_v57  ;;  %v277_v58 = vpop.f32.mrb[9].mxu1 }
  0xef   :  { %v214_v54 = vadd.f32 %v1368_v57, %v213_v51  ;;  %v1071_v55 = vpop.f32.mrb[10].mxu0  ;;  %1104 = vmatprep.mubr.msk.bf16.mxu1 %vm395_vm1, %v342_v47  ;;  %v278_v61 = vadd.f32 %v1368_v57, %v277_v58  ;;  %v1087_v62 = vpop.f32.mrb[10].mxu1 }
  0xf0   :  { %v225_v59 = vadd.f32 %v1071_v55, %v1368_v57  ;;  %v216_v60 = vpop.f32.mrb[11].mxu0  ;;  %1105 = vmatmul.mubr.msk.bf16.gmra.mrb[20].mxu1 %vm395_vm1, %v343_v45  ;;  %v334_v0 = vmax.f32 %v286_v56, 0.0  ;;  %v289_v1 = vadd.f32 %v1087_v62, %v1368_v57  ;;  %v280_v2 = vpop.f32.mrb[11].mxu1  ;;  %v318_v3 = vmax.f32 %v222_v50, 0.0 }
  0xf1   :  { %v217_v63 = vadd.f32 %v1368_v57, %v216_v60  ;;  %v332_v5 = vmax.f32 %v278_v61, 0.0  ;;  %v281_v6 = vadd.f32 %v1368_v57, %v280_v2  ;;  %v316_v7 = vmax.f32 %v214_v54, 0.0 }
  0xf2   :  { %v319_v4 = vmax.f32 %v225_v59, 0.0  ;;  %v335_v9 = vmax.f32 %v289_v1, 0.0 }
  0xf3   :  { %v317_v8 = vmax.f32 %v217_v63, 0.0  ;;  %v333_v11 = vmax.f32 %v281_v6, 0.0 }
  0xf4   :  { %v345_v10 = vpack.c.bf16 %v319_v4, %v318_v3  ;;  %v353_v14 = vpack.c.bf16 %v335_v9, %v334_v0 }
  0xf5   :  { %v344_v12 = vpack.c.bf16 %v317_v8, %v316_v7  ;;  %v1074_v13 = vpop.f32.mrb[12].mxu0  ;;  %v352_v17 = vpack.c.bf16 %v333_v11, %v332_v5  ;;  %v1090_v18 = vpop.f32.mrb[12].mxu1 }
  0xf6   :  { %v238_v15 = vadd.f32 %v1074_v13, %v1368_v57  ;;  %v229_v16 = vpop.f32.mrb[13].mxu0  ;;  %v302_v22 = vadd.f32 %v1090_v18, %v1368_v57  ;;  %v293_v23 = vpop.f32.mrb[13].mxu1 }
  0xf7   :  { %v230_v19 = vadd.f32 %v1368_v57, %v229_v16  ;;  %v1075_v20 = vpop.f32.mrb[14].mxu0  ;;  %1108 = vmatprep.mubr.msk.bf16.mxu1 %vm395_vm1, %v344_v12  ;;  %v294_v27 = vadd.f32 %v1368_v57, %v293_v23  ;;  %v1091_v28 = vpop.f32.mrb[14].mxu1 }
  0xf8   :  { %v241_v25 = vadd.f32 %v1075_v20, %v1368_v57  ;;  %v232_v26 = vpop.f32.mrb[15].mxu0  ;;  %1109 = vmatmul.mubr.msk.bf16.gmra.mrb[24].mxu1 %vm395_vm1, %v345_v10  ;;  %v338_v30 = vmax.f32 %v302_v22, 0.0  ;;  %v305_v31 = vadd.f32 %v1091_v28, %v1368_v57  ;;  %v296_v32 = vpop.f32.mrb[15].mxu1  ;;  %v322_v33 = vmax.f32 %v238_v15, 0.0 }
  0xf9   :  { %v233_v29 = vadd.f32 %v1368_v57, %v232_v26  ;;  %v336_v35 = vmax.f32 %v294_v27, 0.0  ;;  %v297_v36 = vadd.f32 %v1368_v57, %v296_v32  ;;  %v320_v37 = vmax.f32 %v230_v19, 0.0  ;;  %v1185_v57 = vld [vmem:[%s1619_s3 + $0x18] sm:$0xff]  }
  0xfa   :  { %v323_v34 = vmax.f32 %v241_v25, 0.0  ;;  %v339_v39 = vmax.f32 %v305_v31, 0.0  ;;  %1138 = vmatprep.subr.bf16.mxu0 %v1185_v57 }
  0xfb   :  { %v321_v38 = vmax.f32 %v233_v29, 0.0  ;;  %v337_v41 = vmax.f32 %v297_v36, 0.0  ;;  %1139 = vmatpush3.bf16.msra.mxu0 %v1185_v57 }
  0xfc   :  { %v347_v40 = vpack.c.bf16 %v323_v34, %v322_v33  ;;  %v355_v43 = vpack.c.bf16 %v339_v39, %v338_v30 }
  0xfd   :  { %v346_v42 = vpack.c.bf16 %v321_v38, %v320_v37  ;;  %v354_v44 = vpack.c.bf16 %v337_v41, %v336_v35 }
  0xff   :  { %1112 = vmatprep.mubr.msk.bf16.mxu1 %vm395_vm1, %v346_v42 }
 0x100   :  { %1113 = vmatmul.mubr.msk.bf16.gmra.mrb[28].mxu1 %vm395_vm1, %v347_v40 }
 0x101   :  { %1116 = vmatprep.mubr.msk.bf16.mxu1 %vm395_vm1, %v1381_v24 }
 0x108   :  { %1117 = vmatmul.mubr.msk.bf16.gmra.mrb[32].mxu1 %vm395_vm1, %v1378_v21  ;;  %v1433_v21 = vld [vmem:[%s1621_s5] ss:$0 sm:$0xff] }
 0x109   :  { %1120 = vmatprep.mubr.msk.bf16.mxu1 %vm395_vm1, %v350_v52 }
 0x110   :  { %1121 = vmatmul.mubr.msk.bf16.gmra.mrb[36].mxu1 %vm395_vm1, %v1392_v49 }
 0x111   :  { %1124 = vmatprep.mubr.msk.bf16.mxu1 %vm395_vm1, %v352_v17 }
 0x118   :  { %1125 = vmatmul.mubr.msk.bf16.gmra.mrb[40].mxu1 %vm395_vm1, %v353_v14 }
 0x119   :  { %1128 = vmatprep.mubr.msk.bf16.mxu1 %vm395_vm1, %v354_v44 }
 0x120   :  { %1129 = vmatmul.mubr.msk.bf16.gmra.mrb[44].mxu1 %vm395_vm1, %v355_v43 }
 0x1bb   :  { %v1102_v24 = vpop.f32.mrb[16].mxu1 }
 0x1bc   :  { %v487_v45 = vadd.f32 %v1102_v24, %v1433_v21  ;;  %v478_v46 = vpop.f32.mrb[17].mxu1 }
 0x1bd   :  { %v479_v47 = vadd.f32 %v1433_v21, %v478_v46  ;;  %v1103_v48 = vpop.f32.mrb[18].mxu1 }
 0x1be   :  { %v490_v49 = vadd.f32 %v1103_v48, %v1433_v21  ;;  %v481_v50 = vpop.f32.mrb[19].mxu1  ;;  %v607_v52 = vmax.f32 %v487_v45, 0.0 }
 0x1bf   :  { %v482_v51 = vadd.f32 %v1433_v21, %v481_v50  ;;  %v605_v54 = vmax.f32 %v479_v47, 0.0 }
 0x1c0   :  { %v608_v53 = vmax.f32 %v490_v49, 0.0 }
 0x1c1   :  { %v606_v55 = vmax.f32 %v482_v51, 0.0 }
 0x1c2   :  { %v638_v56 = vpack.c.bf16 %v608_v53, %v607_v52 }
 0x1c3   :  { %v637_v58 = vpack.c.bf16 %v606_v55, %v605_v54  ;;  %v1106_v59 = vpop.f32.mrb[20].mxu1 }
 0x1c4   :  { %v503_v60 = vadd.f32 %v1106_v59, %v1433_v21  ;;  %v494_v61 = vpop.f32.mrb[21].mxu1 }
 0x1c5   :  { %v495_v62 = vadd.f32 %v1433_v21, %v494_v61  ;;  %v1107_v63 = vpop.f32.mrb[22].mxu1  ;;  %1140 = vmatprep.mubr.msk.bf16.mxu0 %vm395_vm1, %v637_v58 }
 0x1c6   :  { %v506_v0 = vadd.f32 %v1107_v63, %v1433_v21  ;;  %v497_v1 = vpop.f32.mrb[23].mxu1  ;;  %1141 = vmatmul.mubr.msk.bf16.vlgmr.msra.gmra.mrb[16].mxu0 %vm395_vm1, %v638_v56  ;;  %v611_v3 = vmax.f32 %v503_v60, 0.0 }
 0x1c7   :  { %v498_v2 = vadd.f32 %v1433_v21, %v497_v1  ;;  %v609_v5 = vmax.f32 %v495_v62, 0.0 }
 0x1c8   :  { %v612_v4 = vmax.f32 %v506_v0, 0.0 }
 0x1c9   :  { %v610_v6 = vmax.f32 %v498_v2, 0.0 }
 0x1ca   :  { %v640_v7 = vpack.c.bf16 %v612_v4, %v611_v3 }
 0x1cb   :  { %v639_v8 = vpack.c.bf16 %v610_v6, %v609_v5  ;;  %v1110_v9 = vpop.f32.mrb[24].mxu1 }
 0x1cc   :  { %v519_v10 = vadd.f32 %v1110_v9, %v1433_v21  ;;  %v510_v11 = vpop.f32.mrb[25].mxu1 }
 0x1cd   :  { %v511_v12 = vadd.f32 %v1433_v21, %v510_v11  ;;  %v1111_v13 = vpop.f32.mrb[26].mxu1  ;;  %1144 = vmatprep.mubr.msk.bf16.mxu0 %vm395_vm1, %v639_v8 }
 0x1ce   :  { %v522_v14 = vadd.f32 %v1111_v13, %v1433_v21  ;;  %v513_v15 = vpop.f32.mrb[27].mxu1  ;;  %1145 = vmatmul.mubr.msk.bf16.gmra.mrb[20].mxu0 %vm395_vm1, %v640_v7  ;;  %v615_v17 = vmax.f32 %v519_v10, 0.0 }
 0x1cf   :  { %v514_v16 = vadd.f32 %v1433_v21, %v513_v15  ;;  %v613_v19 = vmax.f32 %v511_v12, 0.0 }
 0x1d0   :  { %v616_v18 = vmax.f32 %v522_v14, 0.0 }
 0x1d1   :  { %v614_v20 = vmax.f32 %v514_v16, 0.0 }
 0x1d2   :  { %v642_v22 = vpack.c.bf16 %v616_v18, %v615_v17 }
 0x1d3   :  { %v641_v23 = vpack.c.bf16 %v614_v20, %v613_v19  ;;  %v1114_v25 = vpop.f32.mrb[28].mxu1 }
 0x1d4   :  { %v535_v26 = vadd.f32 %v1114_v25, %v1433_v21  ;;  %v526_v27 = vpop.f32.mrb[29].mxu1 }
 0x1d5   :  { %v527_v28 = vadd.f32 %v1433_v21, %v526_v27  ;;  %v1115_v29 = vpop.f32.mrb[30].mxu1  ;;  %1148 = vmatprep.mubr.msk.bf16.mxu0 %vm395_vm1, %v641_v23 }
 0x1d6   :  { %v538_v30 = vadd.f32 %v1115_v29, %v1433_v21  ;;  %v529_v31 = vpop.f32.mrb[31].mxu1  ;;  %1149 = vmatmul.mubr.msk.bf16.gmra.mrb[24].mxu0 %vm395_vm1, %v642_v22  ;;  %v619_v33 = vmax.f32 %v535_v26, 0.0 }
 0x1d7   :  { %v530_v32 = vadd.f32 %v1433_v21, %v529_v31  ;;  %v617_v35 = vmax.f32 %v527_v28, 0.0 }
 0x1d8   :  { %v620_v34 = vmax.f32 %v538_v30, 0.0 }
 0x1d9   :  { %v618_v36 = vmax.f32 %v530_v32, 0.0  ;;  %v1486_v32 = vld [vmem:[%s1622_s6] ss:$0 sm:$0xff] }
 0x1da   :  { %v644_v37 = vpack.c.bf16 %v620_v34, %v619_v33 }
 0x1db   :  { %v643_v38 = vpack.c.bf16 %v618_v36, %v617_v35  ;;  %v1118_v39 = vpop.f32.mrb[32].mxu1 }
 0x1dc   :  { %v551_v40 = vadd.f32 %v1118_v39, %v1433_v21  ;;  %v542_v41 = vpop.f32.mrb[33].mxu1 }
 0x1dd   :  { %v543_v42 = vadd.f32 %v1433_v21, %v542_v41  ;;  %v1119_v43 = vpop.f32.mrb[34].mxu1  ;;  %1152 = vmatprep.mubr.msk.bf16.mxu0 %vm395_vm1, %v643_v38 }
 0x1de   :  { %v554_v44 = vadd.f32 %v1119_v43, %v1433_v21  ;;  %v545_v57 = vpop.f32.mrb[35].mxu1  ;;  %1153 = vmatmul.mubr.msk.bf16.gmra.mrb[28].mxu0 %vm395_vm1, %v644_v37  ;;  %v623_v45 = vmax.f32 %v551_v40, 0.0 }
 0x1df   :  { %v546_v24 = vadd.f32 %v1433_v21, %v545_v57  ;;  %v621_v47 = vmax.f32 %v543_v42, 0.0 }
 0x1e0   :  { %v624_v46 = vmax.f32 %v554_v44, 0.0 }
 0x1e1   :  { %v622_v48 = vmax.f32 %v546_v24, 0.0 }
 0x1e2   :  { %v646_v49 = vpack.c.bf16 %v624_v46, %v623_v45 }
 0x1e3   :  { %v645_v50 = vpack.c.bf16 %v622_v48, %v621_v47  ;;  %v1122_v51 = vpop.f32.mrb[36].mxu1 }
 0x1e4   :  { %v567_v52 = vadd.f32 %v1122_v51, %v1433_v21  ;;  %v558_v53 = vpop.f32.mrb[37].mxu1 }
 0x1e5   :  { %v559_v54 = vadd.f32 %v1433_v21, %v558_v53  ;;  %v1123_v55 = vpop.f32.mrb[38].mxu1  ;;  %1156 = vmatprep.mubr.msk.bf16.mxu0 %vm395_vm1, %v645_v50 }
 0x1e6   :  { %v570_v56 = vadd.f32 %v1123_v55, %v1433_v21  ;;  %v561_v58 = vpop.f32.mrb[39].mxu1  ;;  %1157 = vmatmul.mubr.msk.bf16.gmra.mrb[32].mxu0 %vm395_vm1, %v646_v49  ;;  %v627_v60 = vmax.f32 %v567_v52, 0.0 }
 0x1e7   :  { %v562_v59 = vadd.f32 %v1433_v21, %v561_v58  ;;  %v625_v62 = vmax.f32 %v559_v54, 0.0 }
 0x1e8   :  { %v628_v61 = vmax.f32 %v570_v56, 0.0 }
 0x1e9   :  { %v626_v63 = vmax.f32 %v562_v59, 0.0 }
 0x1ea   :  { %v648_v0 = vpack.c.bf16 %v628_v61, %v627_v60 }
 0x1eb   :  { %v647_v1 = vpack.c.bf16 %v626_v63, %v625_v62  ;;  %v1126_v2 = vpop.f32.mrb[40].mxu1 }
 0x1ec   :  { %v583_v3 = vadd.f32 %v1126_v2, %v1433_v21  ;;  %v574_v4 = vpop.f32.mrb[41].mxu1 }
 0x1ed   :  { %v575_v5 = vadd.f32 %v1433_v21, %v574_v4  ;;  %v1127_v6 = vpop.f32.mrb[42].mxu1  ;;  %1160 = vmatprep.mubr.msk.bf16.mxu0 %vm395_vm1, %v647_v1 }
 0x1ee   :  { %v586_v7 = vadd.f32 %v1127_v6, %v1433_v21  ;;  %v577_v8 = vpop.f32.mrb[43].mxu1  ;;  %1161 = vmatmul.mubr.msk.bf16.gmra.mrb[36].mxu0 %vm395_vm1, %v648_v0  ;;  %v631_v10 = vmax.f32 %v583_v3, 0.0 }
 0x1ef   :  { %v578_v9 = vadd.f32 %v1433_v21, %v577_v8  ;;  %v629_v12 = vmax.f32 %v575_v5, 0.0 }
 0x1f0   :  { %v632_v11 = vmax.f32 %v586_v7, 0.0 }
 0x1f1   :  { %v630_v13 = vmax.f32 %v578_v9, 0.0 }
 0x1f2   :  { %v650_v14 = vpack.c.bf16 %v632_v11, %v631_v10 }
 0x1f3   :  { %v649_v15 = vpack.c.bf16 %v630_v13, %v629_v12  ;;  %v1130_v16 = vpop.f32.mrb[44].mxu1 }
 0x1f4   :  { %v599_v17 = vadd.f32 %v1130_v16, %v1433_v21  ;;  %v590_v18 = vpop.f32.mrb[45].mxu1 }
 0x1f5   :  { %v591_v19 = vadd.f32 %v1433_v21, %v590_v18  ;;  %v1131_v20 = vpop.f32.mrb[46].mxu1  ;;  %1164 = vmatprep.mubr.msk.bf16.mxu0 %vm395_vm1, %v649_v15 }
 0x1f6   :  { %v602_v22 = vadd.f32 %v1131_v20, %v1433_v21  ;;  %v593_v23 = vpop.f32.mrb[47].mxu1  ;;  %1165 = vmatmul.mubr.msk.bf16.gmra.mrb[40].mxu0 %vm395_vm1, %v650_v14  ;;  %v635_v26 = vmax.f32 %v599_v17, 0.0 }
 0x1f7   :  { %v594_v25 = vadd.f32 %v1433_v21, %v593_v23  ;;  %v633_v28 = vmax.f32 %v591_v19, 0.0 }
 0x1f8   :  { %v636_v27 = vmax.f32 %v602_v22, 0.0 }
 0x1f9   :  { %v634_v29 = vmax.f32 %v594_v25, 0.0 }
 0x1fa   :  { %v652_v30 = vpack.c.bf16 %v636_v27, %v635_v26 }
 0x1fb   :  { %v651_v31 = vpack.c.bf16 %v634_v29, %v633_v28 }
 0x1fd   :  { %1168 = vmatprep.mubr.msk.bf16.mxu0 %vm395_vm1, %v651_v31 }
 0x1fe   :  { %1169 = vmatmul.mubr.msk.bf16.gmra.mrb[44].mxu0 %vm395_vm1, %v652_v30 }
 0x299   :  { %v1142_v33 = vpop.f32.mrb[16].mxu0 }
 0x29a   :  { %v783_v34 = vadd.f32 %v1142_v33, %v1486_v32  ;;  %v774_v35 = vpop.f32.mrb[17].mxu0 }
 0x29b   :  { %v775_v21 = vadd.f32 %v1486_v32, %v774_v35  ;;  %v1143_v36 = vpop.f32.mrb[18].mxu0 }
 0x29c   :  { %903 = vst [vmem:[%s1623_s7 + $0x10] sm:$0xff] %v783_v34  ;;  %v786_v37 = vadd.f32 %v1143_v36, %v1486_v32  ;;  %v777_v38 = vpop.f32.mrb[19].mxu0 }
 0x29d   :  { %901 = vst [vmem:[%s1623_s7] sm:$0xff] %v775_v21  ;;  %v778_v39 = vadd.f32 %v1486_v32, %v777_v38 }
 0x29e   :  { %904 = vst [vmem:[%s1623_s7 + $0x18] sm:$0xff] %v786_v37 }
 0x29f   :  { %902 = vst [vmem:[%s1623_s7 + $0x8] sm:$0xff] %v778_v39 }
 0x2a1   :  { %v1146_v40 = vpop.f32.mrb[20].mxu0 }
 0x2a2   :  { %v799_v41 = vadd.f32 %v1146_v40, %v1486_v32  ;;  %v790_v42 = vpop.f32.mrb[21].mxu0 }
 0x2a3   :  { %v791_v43 = vadd.f32 %v1486_v32, %v790_v42  ;;  %v1147_v44 = vpop.f32.mrb[22].mxu0 }
 0x2a4   :  { %907 = vst [vmem:[%s1623_s7 + $0x30] sm:$0xff] %v799_v41  ;;  %v802_v57 = vadd.f32 %v1147_v44, %v1486_v32  ;;  %v793_v24 = vpop.f32.mrb[23].mxu0 }
 0x2a5   :  { %905 = vst [vmem:[%s1623_s7 + $0x20] sm:$0xff] %v791_v43  ;;  %v794_v45 = vadd.f32 %v1486_v32, %v793_v24 }
 0x2a6   :  { %908 = vst [vmem:[%s1623_s7 + $0x38] sm:$0xff] %v802_v57 }
 0x2a7   :  { %906 = vst [vmem:[%s1623_s7 + $0x28] sm:$0xff] %v794_v45 }
 0x2a9   :  { %v1150_v46 = vpop.f32.mrb[24].mxu0 }
 0x2aa   :  { %v815_v47 = vadd.f32 %v1150_v46, %v1486_v32  ;;  %v806_v48 = vpop.f32.mrb[25].mxu0 }
 0x2ab   :  { %v807_v49 = vadd.f32 %v1486_v32, %v806_v48  ;;  %v1151_v50 = vpop.f32.mrb[26].mxu0 }
 0x2ac   :  { %911 = vst [vmem:[%s1623_s7 + $0x50] sm:$0xff] %v815_v47  ;;  %v818_v51 = vadd.f32 %v1151_v50, %v1486_v32  ;;  %v809_v52 = vpop.f32.mrb[27].mxu0 }
 0x2ad   :  { %909 = vst [vmem:[%s1623_s7 + $0x40] sm:$0xff] %v807_v49  ;;  %v810_v53 = vadd.f32 %v1486_v32, %v809_v52 }
 0x2ae   :  { %912 = vst [vmem:[%s1623_s7 + $0x58] sm:$0xff] %v818_v51 }
 0x2af   :  { %910 = vst [vmem:[%s1623_s7 + $0x48] sm:$0xff] %v810_v53 }
 0x2b1   :  { %v1154_v54 = vpop.f32.mrb[28].mxu0 }
 0x2b2   :  { %v831_v55 = vadd.f32 %v1154_v54, %v1486_v32  ;;  %v822_v56 = vpop.f32.mrb[29].mxu0 }
 0x2b3   :  { %v823_v58 = vadd.f32 %v1486_v32, %v822_v56  ;;  %v1155_v59 = vpop.f32.mrb[30].mxu0 }
 0x2b4   :  { %915 = vst [vmem:[%s1623_s7 + $0x70] sm:$0xff] %v831_v55  ;;  %v834_v60 = vadd.f32 %v1155_v59, %v1486_v32  ;;  %v825_v61 = vpop.f32.mrb[31].mxu0 }
 0x2b5   :  { %913 = vst [vmem:[%s1623_s7 + $0x60] sm:$0xff] %v823_v58  ;;  %v826_v62 = vadd.f32 %v1486_v32, %v825_v61 }
 0x2b6   :  { %916 = vst [vmem:[%s1623_s7 + $0x78] sm:$0xff] %v834_v60 }
 0x2b7   :  { %914 = vst [vmem:[%s1623_s7 + $0x68] sm:$0xff] %v826_v62 }
 0x2b9   :  { %v1158_v63 = vpop.f32.mrb[32].mxu0 }
 0x2ba   :  { %v847_v0 = vadd.f32 %v1158_v63, %v1486_v32  ;;  %v838_v1 = vpop.f32.mrb[33].mxu0 }
 0x2bb   :  { %v839_v2 = vadd.f32 %v1486_v32, %v838_v1  ;;  %v1159_v3 = vpop.f32.mrb[34].mxu0 }
 0x2bc   :  { %919 = vst [vmem:[%s1623_s7 + $0x90] sm:$0xff] %v847_v0  ;;  %v850_v4 = vadd.f32 %v1159_v3, %v1486_v32  ;;  %v841_v5 = vpop.f32.mrb[35].mxu0 }
 0x2bd   :  { %917 = vst [vmem:[%s1623_s7 + $0x80] sm:$0xff] %v839_v2  ;;  %v842_v6 = vadd.f32 %v1486_v32, %v841_v5 }
 0x2be   :  { %920 = vst [vmem:[%s1623_s7 + $0x98] sm:$0xff] %v850_v4 }
 0x2bf   :  { %918 = vst [vmem:[%s1623_s7 + $0x88] sm:$0xff] %v842_v6 }
 0x2c1   :  { %v1162_v7 = vpop.f32.mrb[36].mxu0 }
 0x2c2   :  { %v863_v8 = vadd.f32 %v1162_v7, %v1486_v32  ;;  %v854_v9 = vpop.f32.mrb[37].mxu0 }
 0x2c3   :  { %v855_v10 = vadd.f32 %v1486_v32, %v854_v9  ;;  %v1163_v11 = vpop.f32.mrb[38].mxu0 }
 0x2c4   :  { %923 = vst [vmem:[%s1623_s7 + $0xb0] sm:$0xff] %v863_v8  ;;  %v866_v12 = vadd.f32 %v1163_v11, %v1486_v32  ;;  %v857_v13 = vpop.f32.mrb[39].mxu0 }
 0x2c5   :  { %921 = vst [vmem:[%s1623_s7 + $0xa0] sm:$0xff] %v855_v10  ;;  %v858_v14 = vadd.f32 %v1486_v32, %v857_v13 }
 0x2c6   :  { %924 = vst [vmem:[%s1623_s7 + $0xb8] sm:$0xff] %v866_v12 }
 0x2c7   :  { %922 = vst [vmem:[%s1623_s7 + $0xa8] sm:$0xff] %v858_v14 }
 0x2c9   :  { %v1166_v15 = vpop.f32.mrb[40].mxu0 }
 0x2ca   :  { %v879_v16 = vadd.f32 %v1166_v15, %v1486_v32  ;;  %v870_v17 = vpop.f32.mrb[41].mxu0 }
 0x2cb   :  { %v871_v18 = vadd.f32 %v1486_v32, %v870_v17  ;;  %v1167_v19 = vpop.f32.mrb[42].mxu0 }
 0x2cc   :  { %927 = vst [vmem:[%s1623_s7 + $0xd0] sm:$0xff] %v879_v16  ;;  %v882_v20 = vadd.f32 %v1167_v19, %v1486_v32  ;;  %v873_v22 = vpop.f32.mrb[43].mxu0 }
 0x2cd   :  { %925 = vst [vmem:[%s1623_s7 + $0xc0] sm:$0xff] %v871_v18  ;;  %v874_v23 = vadd.f32 %v1486_v32, %v873_v22 }
 0x2ce   :  { %928 = vst [vmem:[%s1623_s7 + $0xd8] sm:$0xff] %v882_v20 }
 0x2cf   :  { %926 = vst [vmem:[%s1623_s7 + $0xc8] sm:$0xff] %v874_v23 }
 0x2d1   :  { %v1170_v25 = vpop.f32.mrb[44].mxu0 }
 0x2d2   :  { %v895_v26 = vadd.f32 %v1170_v25, %v1486_v32  ;;  %v886_v27 = vpop.f32.mrb[45].mxu0 }
 0x2d3   :  { %v887_v28 = vadd.f32 %v1486_v32, %v886_v27  ;;  %v1171_v29 = vpop.f32.mrb[46].mxu0 }
 0x2d4   :  { %931 = vst [vmem:[%s1623_s7 + $0xf0] sm:$0xff] %v895_v26  ;;  %v898_v30 = vadd.f32 %v1171_v29, %v1486_v32  ;;  %v889_v31 = vpop.f32.mrb[47].mxu0 }
 0x2d5   :  { %929 = vst [vmem:[%s1623_s7 + $0xe0] sm:$0xff] %v887_v28  ;;  %v890_v33 = vadd.f32 %v1486_v32, %v889_v31 }
 0x2d6   :  { %932 = vst [vmem:[%s1623_s7 + $0xf8] sm:$0xff] %v898_v30 }
 0x2d7   :  { %930 = vst [vmem:[%s1623_s7 + $0xe8] sm:$0xff] %v890_v33 }

</bundles_post_ra>
